<compile_context>
chip_gen: v6e
topology: v6e:2x2x1
jax: 0.10.0
libtpu: 0.0.40
codegen_flags: <defaults>
</compile_context>

<pallas_src>
import functools

import jax
import jax.numpy as jnp
from jax.experimental import pallas as pl
from jax.experimental.pallas import tpu as pltpu


def _pesym_kernel(x_ref, w_ref, b_ref, o_ref):
    # x_ref: (TB, N*D)     flat, lane-dense set-batch rows
    # w_ref: (N*D, 2*N*O)  fused weight [blockdiag(W_ind) | tile(W_pool)/N]
    # b_ref: (1, N*O)      individual bias tiled over the set axis
    # o_ref: (TB, N*O)     flat, lane-dense output rows
    no = o_ref.shape[1]
    y = jnp.dot(x_ref[...], w_ref[...], preferred_element_type=jnp.float32)
    out = y[:, :no] + b_ref[...] + jnp.tanh(y[:, no:])
    o_ref[...] = out.astype(o_ref.dtype)


def _pick_tb(batch, row_bytes, target_bytes=2 << 20):
    """Batch tile: ~2 MiB x-block; prefer a divisor of batch (no pad copy)."""
    cap = max(8, (target_bytes // row_bytes) // 8 * 8)
    if batch <= cap:
        return batch
    # Divisor of batch that is a multiple of 8 ((8,128) rule) -> no jnp.pad.
    for tb in range(cap, cap // 2, -8):
        if batch % tb == 0:
            return tb
    return cap  # ragged last block: wrapper pads the batch once


@functools.partial(jax.jit, static_argnames=("tb",))
def pesym_mean_tanh(x, w_ind, b_ind, w_pool, *, tb=None):
    """PESymetryMeanTanh forward.

    x:      (B, N, in_dim)
    w_ind:  (in_dim, out_dim)  individual Linear weight (pre-transposed)
    b_ind:  (out_dim,)         individual Linear bias
    w_pool: (in_dim, out_dim)  pooling Linear weight (pre-transposed, no bias)
    """
    B, N, D = x.shape
    O = w_ind.shape[1]
    ND, NO = N * D, N * O

    # Fused, lane-dense weight (see header comment).  Both branches come out of
    # one MXU pass; the pooled branch columns are pre-replicated over the set
    # axis so the kernel needs no broadcast/reshape at all.
    w_all = jnp.concatenate(
        [jnp.kron(jnp.eye(N, dtype=w_ind.dtype), w_ind),   # (N*D, N*O)
         jnp.tile(w_pool, (N, N)) / N],                    # (N*D, N*O)
        axis=1)                                            # (N*D, 2*N*O)
    b_rep = jnp.tile(b_ind, N).reshape(1, NO)

    row_bytes = ND * x.dtype.itemsize
    if tb is None:
        tb = _pick_tb(B, row_bytes)
    else:
        tb = min(tb, B)
        if tb < B:
            tb = max(8, (tb // 8) * 8)   # (8,128) sublane rule on flat blocks

    n_blocks = pl.cdiv(B, tb)
    b_pad = n_blocks * tb

    x_flat = x.reshape(B, ND)            # lane-dense minor dim (N*D)
    if b_pad != B:
        # TODO(synk): handle the ragged last block in-kernel (scalar-prefetched
        # valid count + masked store) instead of this extra HBM copy.
        x_flat = jnp.pad(x_flat, ((0, b_pad - B), (0, 0)))

    itemsize = x.dtype.itemsize
    flops = 2 * b_pad * ND * (2 * NO)
    bytes_accessed = itemsize * (b_pad * ND + b_pad * NO) + 4 * (ND * 2 * NO + NO)

    out_flat = pl.pallas_call(
        _pesym_kernel,
        out_shape=jax.ShapeDtypeStruct((b_pad, NO), x.dtype),
        grid_spec=pltpu.PrefetchScalarGridSpec(
            num_scalar_prefetch=0,
            grid=(n_blocks,),
            in_specs=[
                pl.BlockSpec((tb, ND), lambda b: (b, 0)),       # x   (streamed)
                pl.BlockSpec((ND, 2 * NO), lambda b: (0, 0)),   # W_all (resident)
                pl.BlockSpec((1, NO), lambda b: (0, 0)),        # bias  (resident)
            ],
            out_specs=pl.BlockSpec((tb, NO), lambda b: (b, 0)),
        ),
        compiler_params=pltpu.CompilerParams(
            dimension_semantics=("parallel",),
            vmem_limit_bytes=32 << 20),
        cost_estimate=pl.CostEstimate(
            flops=flops,
            transcendentals=b_pad * NO,
            bytes_accessed=bytes_accessed),
    )(x_flat, w_all, b_rep)

    return out_flat[:B].reshape(B, N, O)


def _reference(x, w_ind, b_ind, w_pool):
    x_mean = jnp.mean(x, axis=-2, keepdims=True)
    pooled = jnp.tanh(x_mean @ w_pool)
    return x @ w_ind + b_ind + pooled


if __name__ == "__main__":
    B, N, IN_DIM, OUT_DIM = 2, 8, 32, 32

    key = jax.random.PRNGKey(0)
    kx, kwi, kbi, kwp = jax.random.split(key, 4)

    x = jax.random.normal(kx, (B, N, IN_DIM), dtype=jnp.float32)
    # Deterministic synthetic parameters (PyTorch nn.Linear init ranges, stored
    # transposed as (in_dim, out_dim)).
    bound = 1.0 / (IN_DIM ** 0.5)
    w_ind = jax.random.uniform(kwi, (IN_DIM, OUT_DIM), jnp.float32,
                               minval=-bound, maxval=bound)
    b_ind = jax.random.uniform(kbi, (OUT_DIM,), jnp.float32,
                               minval=-bound, maxval=bound)
    w_pool = jax.random.uniform(kwp, (IN_DIM, OUT_DIM), jnp.float32,
                                minval=-bound, maxval=bound)

    out = jax.block_until_ready(pesym_mean_tanh(x, w_ind, b_ind, w_pool))
    ref = _reference(x, w_ind, b_ind, w_pool)
    assert out.shape == (B, N, OUT_DIM)
    assert jnp.allclose(out, ref, atol=2e-5, rtol=2e-5), \
        float(jnp.max(jnp.abs(out - ref)))

    # Multi-block grid + ragged batch (exercises divisor / pad fallback logic).
    B2 = 40
    x2 = jax.random.normal(jax.random.PRNGKey(1), (B2, N, IN_DIM), jnp.float32)
    out2 = jax.block_until_ready(pesym_mean_tanh(x2, w_ind, b_ind, w_pool, tb=16))
    ref2 = _reference(x2, w_ind, b_ind, w_pool)
    assert out2.shape == (B2, N, OUT_DIM)
    assert jnp.allclose(out2, ref2, atol=2e-5, rtol=2e-5), \
        float(jnp.max(jnp.abs(out2 - ref2)))

    print("KERNEL_OK")
</pallas_src>

<mosaic_0001>
module attributes {stable_mosaic.version = 11 : i64} {
  func.func @_pesym_kernel(%arg0: i32, %arg1: memref<2x256xf32, #tpu.memory_space<vmem>>, %arg2: memref<256x512xf32, #tpu.memory_space<vmem>>, %arg3: memref<1x256xf32, #tpu.memory_space<vmem>>, %arg4: memref<2x256xf32, #tpu.memory_space<vmem>>) attributes {dimension_semantics = [#tpu.dimension_semantics<parallel>], iteration_bounds = array<i64: 1>, scalar_prefetch = 0 : i64, scratch_operands = 0 : i64, tpu.core_type = #tpu.core_type<tc>, window_params = [{transform_indices = @transform_0, window_bounds = array<i64: 2, 256>}, {pipeline_mode = #tpu.pipeline_mode<synchronous>, transform_indices = @transform_1, window_bounds = array<i64: 256, 512>}, {pipeline_mode = #tpu.pipeline_mode<synchronous>, transform_indices = @transform_2, window_bounds = array<i64: 1, 256>}, {transform_indices = @transform_3, window_bounds = array<i64: 2, 256>}]} {
    %c0 = arith.constant 0 : index
    %c0_0 = arith.constant 0 : index
    %0 = vector.load %arg1[%c0, %c0_0] : memref<2x256xf32, #tpu.memory_space<vmem>>, vector<2x256xf32>
    %c0_1 = arith.constant 0 : index
    %c0_2 = arith.constant 0 : index
    %1 = vector.load %arg2[%c0_1, %c0_2] : memref<256x512xf32, #tpu.memory_space<vmem>>, vector<256x512xf32>
    %cst = arith.constant dense<0.000000e+00> : vector<2x512xf32>
    %2 = tpu.matmul %0, %1, %cst {dimension_numbers = #tpu.dot_dimension_numbers<[1], [0], [0], [1], [0, 0, 1, 1], [], []>} : vector<2x256xf32>, vector<256x512xf32>, vector<2x512xf32> -> vector<2x512xf32>
    %3 = vector.extract_strided_slice %2 {offsets = [0, 0], sizes = [2, 256], strides = [1, 1]} : vector<2x512xf32> to vector<2x256xf32>
    %c0_3 = arith.constant 0 : index
    %c0_4 = arith.constant 0 : index
    %4 = vector.load %arg3[%c0_3, %c0_4] : memref<1x256xf32, #tpu.memory_space<vmem>>, vector<1x256xf32>
    %5 = vector.broadcast %4 : vector<1x256xf32> to vector<2x256xf32>
    %6 = arith.addf %3, %5 : vector<2x256xf32>
    %7 = vector.extract_strided_slice %2 {offsets = [0, 256], sizes = [2, 256], strides = [1, 1]} : vector<2x512xf32> to vector<2x256xf32>
    %8 = math.tanh %7 : vector<2x256xf32>
    %9 = arith.addf %6, %8 : vector<2x256xf32>
    %c0_5 = arith.constant 0 : index
    %c0_6 = arith.constant 0 : index
    %10 = vector.load %arg4[%c0_5, %c0_6] : memref<2x256xf32, #tpu.memory_space<vmem>>, vector<2x256xf32>
    tpu.vector_store %arg4[%c0_5, %c0_6], %9 {strides = array<i32>} : memref<2x256xf32, #tpu.memory_space<vmem>>, vector<2x256xf32>,
    return
  }
  func.func @transform_0(%arg0: i32) -> (i32, i32) {
    %c0_i32 = arith.constant 0 : i32
    %c0_i32_0 = arith.constant 0 : i32
    return %arg0, %c0_i32 : i32, i32
  }
  func.func @transform_1(%arg0: i32) -> (i32, i32) {
    %c0_i32 = arith.constant 0 : i32
    %c0_i32_0 = arith.constant 0 : i32
    %c0_i32_1 = arith.constant 0 : i32
    return %c0_i32, %c0_i32_0 : i32, i32
  }
  func.func @transform_2(%arg0: i32) -> (i32, i32) {
    %c0_i32 = arith.constant 0 : i32
    %c0_i32_0 = arith.constant 0 : i32
    %c0_i32_1 = arith.constant 0 : i32
    return %c0_i32, %c0_i32_0 : i32, i32
  }
  func.func @transform_3(%arg0: i32) -> (i32, i32) {
    %c0_i32 = arith.constant 0 : i32
    %c0_i32_0 = arith.constant 0 : i32
    return %arg0, %c0_i32 : i32, i32
  }
}

</mosaic_0001>

<bundles_post_ra>
// kernel: tile.18
= control target key start
LH: loop header
LB: loop body
LE: loop exit
PB: predicated region body
PF: predicated region fallthrough
CT: control target
= control target key end

     0   :  { %s22_s0 = inlined_call_operand.vmem [shape: f32[32], index: 0, kind: input, shape index: {}]   ;;  %s23_s1 = inlined_call_operand.vmem [shape: f32[8,32], index: 1, kind: output, shape index: {}]  }
   0x1   :  { %v4_v0 = vld [vmem:[%s22_s0] ss:$0 sm:$0xff] }
   0x2   :  { %5 = vst [vmem:[%s23_s1] sm:$0xff] %v4_v0 }

// kernel: tile.19
= control target key start
LH: loop header
LB: loop body
LE: loop exit
PB: predicated region body
PF: predicated region fallthrough
CT: control target
= control target key end

     0   :  { %s7_s6 = smov 3  ;;  %s14_s9 = smov 3  ;;  %vm4_vm0 = vcmask 261120   ;;  %vm11_vm1 = vcmask 1048320   ;;  %vm18_vm2 = vcmask 785920   ;;  %vm25_vm3 = vcmask 523520   ;;  %s79_s0 = inlined_call_operand.vmem [shape: f32[8,32], index: 0, kind: input, shape index: {}]   ;;  %s80_s1 = inlined_call_operand.vmem [shape: f32[1,256], index: 1, kind: output, shape index: {}]  }
   0x1   :  { %v41_v0 = vld [vmem:[%s79_s0 + $0x3] ss:$4 sm:%s7_s6]   ;;  %s48_s10 = smov 96   ;;  %s21_s11 = smov 3  ;;  %v42_v1 = vld [vmem:[%s79_s0 + $0x2] ss:$4 sm:%s14_s9]  }
   0x2   :  { %9 = vrot.lane.b32.xlu0 %v41_v0, %s48_s10  ;;  %v43_v2 = vld [vmem:[%s79_s0 + $0x1] ss:$4 sm:%s21_s11]   ;;  %s2_s16 = smov 3  ;;  %s49_s17 = smov 32  }
   0x3   :  { %23 = vrot.lane.b32.xlu1 %v43_v2, %s49_s17  ;;  %v3_v3 = vld [vmem:[%s79_s0] ss:$4 sm:%s2_s16]   ;;  %s50_s0 = smov 64  }
   0x4   :  { %5 = vst.msk [vmem:[#allocation0] ss:$8 sm:$0x3] %vm4_vm0, %v3_v3  }
   0x6   :  { %16 = vrot.lane.b32.xlu0 %v42_v1, %s50_s0 }
  0x74   :  { %v10_v4 = vpop.permute.xlu0 %9  }
  0x75   :  { %12 = vst.msk [vmem:[#allocation0] ss:$8 sm:$0x3] %vm11_vm1, %v10_v4   ;;  %v24_v5 = vpop.permute.xlu1 %23  }
  0x78   :  { %v17_v6 = vpop.permute.xlu0 %16  }
  0x79   :  { %19 = vst.msk [vmem:[#allocation0] ss:$8 sm:$0x3] %vm18_vm2, %v17_v6  }
  0x7a   :  { %26 = vst.msk [vmem:[#allocation0] ss:$8 sm:$0x3] %vm25_vm3, %v24_v5  }
  0x81   :  { %v31_v7 = vld [vmem:[#allocation0] sm:$0x1]  ;;  %v36_v8 = vld [vmem:[#allocation0 + $0x8] sm:$0x1] }
  0x82   :  { %34 = vst [vmem:[%s80_s1] sm:$0x1] %v31_v7  ;;  %44 = vst [vmem:[%s80_s1 + $0x1] sm:$0x1] %v36_v8 }

// kernel: pesym_mean_tanh.1
= control target key start
LH: loop header
LB: loop body
LE: loop exit
PB: predicated region body
PF: predicated region fallthrough
CT: control target
= control target key end

     0   :  { %s749_s1 = inlined_call_operand.vmem [shape: f32[256,512], index: 1, kind: input, shape index: {}]   ;;  %s750_s0 = inlined_call_operand.vmem [shape: f32[2,256], index: 0, kind: input, shape index: {}]   ;;  %s751_s2 = inlined_call_operand.vmem [shape: f32[1,256], index: 2, kind: input, shape index: {}]   ;;  %s752_s3 = inlined_call_operand.vmem [shape: f32[2,256], index: 3, kind: output, shape index: {}]  }
   0x1   :  { %v78_v0 = vld [vmem:[%s749_s1 + $0x1f8] sm:$0xff]  ;;  %v77_v1 = vld [vmem:[%s749_s1 + $0x1f0] sm:$0xff]  ;;  %v76_v6 = vld [vmem:[%s749_s1 + $0x1e8] sm:$0xff] }
   0x2   :  { %v74_v2 = vld [vmem:[%s749_s1 + $0x1d8] sm:$0xff]  ;;  %225 = vmatprep.subr.mxu1 %v78_v0  ;;  %v73_v3 = vld [vmem:[%s749_s1 + $0x1d0] sm:$0xff]  ;;  %154 = vmatprep.subr.mxu0 %v76_v6  ;;  %v75_v8 = vld [vmem:[%s749_s1 + $0x1e0] sm:$0xff] }
   0x3   :  { %226 = vmatpush1.msra.mxu1 %v77_v1  ;;  %v70_v4 = vld [vmem:[%s749_s1 + $0x1b8] sm:$0xff]  ;;  %v69_v5 = vld [vmem:[%s749_s1 + $0x1b0] sm:$0xff]  ;;  %v72_v9 = vld [vmem:[%s749_s1 + $0x1c8] sm:$0xff]  ;;  %155 = vmatpush1.msra.mxu0 %v75_v8 }
   0x4   :  { %227 = vmatprep.subr.mxu1 %v74_v2  ;;  %v66_v7 = vld [vmem:[%s749_s1 + $0x198] sm:$0xff]  ;;  %v65_v10 = vld [vmem:[%s749_s1 + $0x190] sm:$0xff]  ;;  %v71_v11 = vld [vmem:[%s749_s1 + $0x1c0] sm:$0xff]  ;;  %156 = vmatprep.subr.mxu0 %v72_v9 }
   0x5   :  { %228 = vmatpush1.msra.mxu1 %v73_v3  ;;  %v62_v12 = vld [vmem:[%s749_s1 + $0x178] sm:$0xff]  ;;  %v68_v13 = vld [vmem:[%s749_s1 + $0x1a8] sm:$0xff]  ;;  %v67_v14 = vld [vmem:[%s749_s1 + $0x1a0] sm:$0xff]  ;;  %157 = vmatpush1.msra.mxu0 %v71_v11 }
   0x6   :  { %229 = vmatprep.subr.mxu1 %v70_v4  ;;  %v61_v15 = vld [vmem:[%s749_s1 + $0x170] sm:$0xff]  ;;  %v64_v16 = vld [vmem:[%s749_s1 + $0x188] sm:$0xff]  ;;  %v58_v17 = vld [vmem:[%s749_s1 + $0x158] sm:$0xff]  ;;  %158 = vmatprep.subr.mxu0 %v68_v13 }
   0x7   :  { %230 = vmatpush1.msra.mxu1 %v69_v5  ;;  %v63_v18 = vld [vmem:[%s749_s1 + $0x180] sm:$0xff]  ;;  %v57_v19 = vld [vmem:[%s749_s1 + $0x150] sm:$0xff]  ;;  %159 = vmatpush1.msra.mxu0 %v67_v14  ;;  %v60_v20 = vld [vmem:[%s749_s1 + $0x168] sm:$0xff] }
   0x8   :  { %231 = vmatprep.subr.mxu1 %v66_v7  ;;  %v54_v21 = vld [vmem:[%s749_s1 + $0x138] sm:$0xff]  ;;  %160 = vmatprep.subr.mxu0 %v64_v16  ;;  %v59_v22 = vld [vmem:[%s749_s1 + $0x160] sm:$0xff]  ;;  %v53_v23 = vld [vmem:[%s749_s1 + $0x130] sm:$0xff] }
   0x9   :  { %232 = vmatpush1.msra.mxu1 %v65_v10  ;;  %161 = vmatpush1.msra.mxu0 %v63_v18  ;;  %v56_v24 = vld [vmem:[%s749_s1 + $0x148] sm:$0xff]  ;;  %v50_v25 = vld [vmem:[%s749_s1 + $0x118] sm:$0xff]  ;;  %v55_v26 = vld [vmem:[%s749_s1 + $0x140] sm:$0xff] }
   0xa   :  { %233 = vmatprep.subr.mxu1 %v62_v12  ;;  %162 = vmatprep.subr.mxu0 %v60_v20  ;;  %v49_v27 = vld [vmem:[%s749_s1 + $0x110] sm:$0xff]  ;;  %v52_v28 = vld [vmem:[%s749_s1 + $0x128] sm:$0xff]  ;;  %v46_v29 = vld [vmem:[%s749_s1 + $0xf8] sm:$0xff] }
   0xb   :  { %234 = vmatpush1.msra.mxu1 %v61_v15  ;;  %163 = vmatpush1.msra.mxu0 %v59_v22  ;;  %v51_v30 = vld [vmem:[%s749_s1 + $0x120] sm:$0xff]  ;;  %v45_v31 = vld [vmem:[%s749_s1 + $0xf0] sm:$0xff]  ;;  %v48_v32 = vld [vmem:[%s749_s1 + $0x108] sm:$0xff] }
   0xc   :  { %235 = vmatprep.subr.mxu1 %v58_v17  ;;  %164 = vmatprep.subr.mxu0 %v56_v24  ;;  %v42_v33 = vld [vmem:[%s749_s1 + $0xd8] sm:$0xff]  ;;  %v47_v34 = vld [vmem:[%s749_s1 + $0x100] sm:$0xff]  ;;  %v41_v35 = vld [vmem:[%s749_s1 + $0xd0] sm:$0xff] }
   0xd   :  { %236 = vmatpush1.msra.mxu1 %v57_v19  ;;  %165 = vmatpush1.msra.mxu0 %v55_v26  ;;  %v44_v36 = vld [vmem:[%s749_s1 + $0xe8] sm:$0xff]  ;;  %v38_v37 = vld [vmem:[%s749_s1 + $0xb8] sm:$0xff]  ;;  %v43_v38 = vld [vmem:[%s749_s1 + $0xe0] sm:$0xff] }
   0xe   :  { %237 = vmatprep.subr.mxu1 %v54_v21  ;;  %166 = vmatprep.subr.mxu0 %v52_v28  ;;  %v37_v39 = vld [vmem:[%s749_s1 + $0xb0] sm:$0xff]  ;;  %v40_v40 = vld [vmem:[%s749_s1 + $0xc8] sm:$0xff]  ;;  %v34_v41 = vld [vmem:[%s749_s1 + $0x98] sm:$0xff] }
   0xf   :  { %238 = vmatpush1.msra.mxu1 %v53_v23  ;;  %167 = vmatpush1.msra.mxu0 %v51_v30  ;;  %v39_v42 = vld [vmem:[%s749_s1 + $0xc0] sm:$0xff]  ;;  %v33_v43 = vld [vmem:[%s749_s1 + $0x90] sm:$0xff]  ;;  %v36_v44 = vld [vmem:[%s749_s1 + $0xa8] sm:$0xff] }
  0x10   :  { %239 = vmatprep.subr.mxu1 %v50_v25  ;;  %168 = vmatprep.subr.mxu0 %v48_v32  ;;  %v30_v45 = vld [vmem:[%s749_s1 + $0x78] sm:$0xff]  ;;  %v35_v46 = vld [vmem:[%s749_s1 + $0xa0] sm:$0xff]  ;;  %v29_v47 = vld [vmem:[%s749_s1 + $0x70] sm:$0xff] }
  0x11   :  { %240 = vmatpush1.msra.mxu1 %v49_v27  ;;  %169 = vmatpush1.msra.mxu0 %v47_v34  ;;  %v32_v48 = vld [vmem:[%s749_s1 + $0x88] sm:$0xff]  ;;  %v26_v49 = vld [vmem:[%s749_s1 + $0x58] sm:$0xff]  ;;  %v31_v50 = vld [vmem:[%s749_s1 + $0x80] sm:$0xff] }
  0x12   :  { %241 = vmatprep.subr.mxu1 %v46_v29  ;;  %170 = vmatprep.subr.mxu0 %v44_v36  ;;  %v25_v51 = vld [vmem:[%s749_s1 + $0x50] sm:$0xff]  ;;  %v28_v52 = vld [vmem:[%s749_s1 + $0x68] sm:$0xff]  ;;  %v22_v53 = vld [vmem:[%s749_s1 + $0x38] sm:$0xff] }
  0x13   :  { %242 = vmatpush1.msra.mxu1 %v45_v31  ;;  %171 = vmatpush1.msra.mxu0 %v43_v38  ;;  %v27_v54 = vld [vmem:[%s749_s1 + $0x60] sm:$0xff]  ;;  %v21_v55 = vld [vmem:[%s749_s1 + $0x30] sm:$0xff]  ;;  %v24_v56 = vld [vmem:[%s749_s1 + $0x48] sm:$0xff] }
  0x14   :  { %243 = vmatprep.subr.mxu1 %v42_v33  ;;  %172 = vmatprep.subr.mxu0 %v40_v40  ;;  %v18_v57 = vld [vmem:[%s749_s1 + $0x18] sm:$0xff]  ;;  %v23_v58 = vld [vmem:[%s749_s1 + $0x40] sm:$0xff]  ;;  %v17_v59 = vld [vmem:[%s749_s1 + $0x10] sm:$0xff] }
  0x15   :  { %244 = vmatpush1.msra.mxu1 %v41_v35  ;;  %173 = vmatpush1.msra.mxu0 %v39_v42  ;;  %v20_v60 = vld [vmem:[%s749_s1 + $0x28] sm:$0xff]  ;;  %v142_v61 = vld [vmem:[%s749_s1 + $0x3f8] sm:$0xff]  ;;  %v19_v62 = vld [vmem:[%s749_s1 + $0x20] sm:$0xff] }
  0x16   :  { %245 = vmatprep.subr.mxu1 %v38_v37  ;;  %174 = vmatprep.subr.mxu0 %v36_v44  ;;  %v141_v63 = vld [vmem:[%s749_s1 + $0x3f0] sm:$0xff]  ;;  %v16_v0 = vld [vmem:[%s749_s1 + $0x8] sm:$0xff]  ;;  %v138_v1 = vld [vmem:[%s749_s1 + $0x3d8] sm:$0xff] }
  0x17   :  { %246 = vmatpush1.msra.mxu1 %v37_v39  ;;  %175 = vmatpush1.msra.mxu0 %v35_v46  ;;  %v15_v2 = vld [vmem:[%s749_s1] sm:$0xff]  ;;  %v137_v3 = vld [vmem:[%s749_s1 + $0x3d0] sm:$0xff]  ;;  %v140_v4 = vld [vmem:[%s749_s1 + $0x3e8] sm:$0xff] }
  0x18   :  { %247 = vmatprep.subr.mxu1 %v34_v41  ;;  %176 = vmatprep.subr.mxu0 %v32_v48  ;;  %v134_v5 = vld [vmem:[%s749_s1 + $0x3b8] sm:$0xff]  ;;  %v139_v6 = vld [vmem:[%s749_s1 + $0x3e0] sm:$0xff]  ;;  %v133_v7 = vld [vmem:[%s749_s1 + $0x3b0] sm:$0xff] }
  0x19   :  { %248 = vmatpush1.msra.mxu1 %v33_v43  ;;  %177 = vmatpush1.msra.mxu0 %v31_v50  ;;  %v136_v8 = vld [vmem:[%s749_s1 + $0x3c8] sm:$0xff]  ;;  %v130_v9 = vld [vmem:[%s749_s1 + $0x398] sm:$0xff]  ;;  %v135_v10 = vld [vmem:[%s749_s1 + $0x3c0] sm:$0xff] }
  0x1a   :  { %249 = vmatprep.subr.mxu1 %v30_v45  ;;  %178 = vmatprep.subr.mxu0 %v28_v52  ;;  %v129_v11 = vld [vmem:[%s749_s1 + $0x390] sm:$0xff]  ;;  %v132_v12 = vld [vmem:[%s749_s1 + $0x3a8] sm:$0xff]  ;;  %v126_v13 = vld [vmem:[%s749_s1 + $0x378] sm:$0xff] }
  0x1b   :  { %250 = vmatpush1.msra.mxu1 %v29_v47  ;;  %179 = vmatpush1.msra.mxu0 %v27_v54  ;;  %v131_v14 = vld [vmem:[%s749_s1 + $0x3a0] sm:$0xff]  ;;  %v125_v15 = vld [vmem:[%s749_s1 + $0x370] sm:$0xff]  ;;  %v128_v16 = vld [vmem:[%s749_s1 + $0x388] sm:$0xff] }
  0x1c   :  { %251 = vmatprep.subr.mxu1 %v26_v49  ;;  %180 = vmatprep.subr.mxu0 %v24_v56  ;;  %v122_v17 = vld [vmem:[%s749_s1 + $0x358] sm:$0xff]  ;;  %v127_v18 = vld [vmem:[%s749_s1 + $0x380] sm:$0xff]  ;;  %v121_v19 = vld [vmem:[%s749_s1 + $0x350] sm:$0xff] }
  0x1d   :  { %252 = vmatpush1.msra.mxu1 %v25_v51  ;;  %181 = vmatpush1.msra.mxu0 %v23_v58  ;;  %v124_v20 = vld [vmem:[%s749_s1 + $0x368] sm:$0xff]  ;;  %v118_v21 = vld [vmem:[%s749_s1 + $0x338] sm:$0xff]  ;;  %v123_v22 = vld [vmem:[%s749_s1 + $0x360] sm:$0xff] }
  0x1e   :  { %253 = vmatprep.subr.mxu1 %v22_v53  ;;  %182 = vmatprep.subr.mxu0 %v20_v60  ;;  %v117_v23 = vld [vmem:[%s749_s1 + $0x330] sm:$0xff]  ;;  %v120_v24 = vld [vmem:[%s749_s1 + $0x348] sm:$0xff]  ;;  %v114_v25 = vld [vmem:[%s749_s1 + $0x318] sm:$0xff] }
  0x1f   :  { %254 = vmatpush1.msra.mxu1 %v21_v55  ;;  %183 = vmatpush1.msra.mxu0 %v19_v62  ;;  %v119_v26 = vld [vmem:[%s749_s1 + $0x340] sm:$0xff]  ;;  %v113_v27 = vld [vmem:[%s749_s1 + $0x310] sm:$0xff]  ;;  %v116_v28 = vld [vmem:[%s749_s1 + $0x328] sm:$0xff] }
  0x20   :  { %255 = vmatprep.subr.mxu1 %v18_v57  ;;  %184 = vmatprep.subr.mxu0 %v16_v0  ;;  %v110_v29 = vld [vmem:[%s749_s1 + $0x2f8] sm:$0xff]  ;;  %v115_v30 = vld [vmem:[%s749_s1 + $0x320] sm:$0xff]  ;;  %v109_v31 = vld [vmem:[%s749_s1 + $0x2f0] sm:$0xff] }
  0x21   :  { %256 = vmatpush1.msra.mxu1 %v17_v59  ;;  %185 = vmatpush1.msra.mxu0 %v15_v2  ;;  %v112_v32 = vld [vmem:[%s749_s1 + $0x308] sm:$0xff]  ;;  %v106_v33 = vld [vmem:[%s749_s1 + $0x2d8] sm:$0xff]  ;;  %v111_v34 = vld [vmem:[%s749_s1 + $0x300] sm:$0xff]  ;;  %v298_v2 = vlaneseq }
  0x22   :  { %257 = vmatprep.subr.mxu1 %v142_v61  ;;  %186 = vmatprep.subr.mxu0 %v140_v4  ;;  %v105_v35 = vld [vmem:[%s749_s1 + $0x2d0] sm:$0xff]  ;;  %v108_v36 = vld [vmem:[%s749_s1 + $0x2e8] sm:$0xff]  ;;  %v102_v37 = vld [vmem:[%s749_s1 + $0x2b8] sm:$0xff] }
  0x23   :  { %258 = vmatpush2.msra.mxu1 %v141_v63  ;;  %187 = vmatpush2.msra.mxu0 %v139_v6  ;;  %v107_v38 = vld [vmem:[%s749_s1 + $0x2e0] sm:$0xff]  ;;  %v101_v39 = vld [vmem:[%s749_s1 + $0x2b0] sm:$0xff]  ;;  %v104_v40 = vld [vmem:[%s749_s1 + $0x2c8] sm:$0xff]  ;;  %v299_v4 = vshrl.u32 %v298_v2, 7 }
  0x24   :  { %259 = vmatprep.subr.mxu1 %v138_v1  ;;  %188 = vmatprep.subr.mxu0 %v136_v8  ;;  %v330_v41 = vld.sshfl [vmem:[%s750_s0] sm:$0x33 pattern:$0x76325410]  ;;  %v98_v42 = vld [vmem:[%s749_s1 + $0x298] sm:$0xff]  ;;  %v97_v44 = vld [vmem:[%s749_s1 + $0x290] sm:$0xff] }
  0x25   :  { %260 = vmatpush2.msra.mxu1 %v137_v3  ;;  %189 = vmatpush2.msra.mxu0 %v135_v10  ;;  %v103_v43 = vld [vmem:[%s749_s1 + $0x2c0] sm:$0xff]  ;;  %v100_v45 = vld [vmem:[%s749_s1 + $0x2a8] sm:$0xff]  ;;  %v94_v46 = vld [vmem:[%s749_s1 + $0x278] sm:$0xff]  ;;  %v151_v48 = vcombine.high %v330_v41, %v330_v41  ;;  %v300_v6 = vsub.s32 0, %v299_v4  ;;  %v304_v8 = vsub.s32 1, %v299_v4 }
  0x26   :  { %261 = vmatprep.subr.mxu1 %v134_v5  ;;  %190 = vmatprep.subr.mxu0 %v132_v12  ;;  %v99_v47 = vld [vmem:[%s749_s1 + $0x2a0] sm:$0xff]  ;;  %v93_v49 = vld [vmem:[%s749_s1 + $0x270] sm:$0xff]  ;;  %v90_v50 = vld [vmem:[%s749_s1 + $0x258] sm:$0xff] }
  0x27   :  { %262 = vmatpush2.msra.mxu1 %v133_v7  ;;  %191 = vmatpush2.msra.mxu0 %v131_v14  ;;  %v96_v51 = vld [vmem:[%s749_s1 + $0x288] sm:$0xff]  ;;  %v89_v52 = vld [vmem:[%s749_s1 + $0x250] sm:$0xff]  ;;  %v95_v53 = vld [vmem:[%s749_s1 + $0x280] sm:$0xff] }
  0x28   :  { %263 = vmatprep.subr.mxu1 %v130_v9  ;;  %192 = vmatprep.subr.mxu0 %v128_v16  ;;  %v86_v54 = vld [vmem:[%s749_s1 + $0x238] sm:$0xff]  ;;  %v92_v55 = vld [vmem:[%s749_s1 + $0x268] sm:$0xff]  ;;  %v85_v56 = vld [vmem:[%s749_s1 + $0x230] sm:$0xff] }
  0x29   :  { %264 = vmatpush2.msra.mxu1 %v129_v11  ;;  %193 = vmatpush2.msra.mxu0 %v127_v18  ;;  %v91_v57 = vld [vmem:[%s749_s1 + $0x260] sm:$0xff]  ;;  %v82_v58 = vld [vmem:[%s749_s1 + $0x218] sm:$0xff]  ;;  %v88_v59 = vld [vmem:[%s749_s1 + $0x248] sm:$0xff] }
  0x2a   :  { %265 = vmatprep.subr.mxu1 %v126_v13  ;;  %194 = vmatprep.subr.mxu0 %v124_v20  ;;  %v81_v60 = vld [vmem:[%s749_s1 + $0x210] sm:$0xff]  ;;  %v87_v61 = vld [vmem:[%s749_s1 + $0x240] sm:$0xff]  ;;  %v84_v62 = vld [vmem:[%s749_s1 + $0x228] sm:$0xff] }
  0x2b   :  { %266 = vmatpush2.msra.mxu1 %v125_v15  ;;  %195 = vmatpush2.msra.mxu0 %v123_v22  ;;  %v83_v63 = vld [vmem:[%s749_s1 + $0x220] sm:$0xff]  ;;  %v80_v0 = vld [vmem:[%s749_s1 + $0x208] sm:$0xff] }
  0x2c   :  { %267 = vmatprep.subr.mxu1 %v122_v17  ;;  %196 = vmatprep.subr.mxu0 %v120_v24  ;;  %v79_v1 = vld [vmem:[%s749_s1 + $0x200] sm:$0xff] }
  0x2d   :  { %268 = vmatpush2.msra.mxu1 %v121_v19  ;;  %197 = vmatpush2.msra.mxu0 %v119_v26  ;;  %v296_v7 = vld [vmem:[%s751_s2] sm:$0x3] }
  0x2e   :  { %269 = vmatprep.subr.mxu1 %v118_v21  ;;  %198 = vmatprep.subr.mxu0 %v116_v28  ;;  %v301_v10 = vrot.slane %v296_v7, %v300_v6  ;;  %v305_v11 = vrot.slane %v296_v7, %v304_v8 }
  0x2f   :  { %270 = vmatpush2.msra.mxu1 %v117_v23  ;;  %199 = vmatpush2.msra.mxu0 %v115_v30 }
  0x30   :  { %271 = vmatprep.subr.mxu1 %v114_v25  ;;  %200 = vmatprep.subr.mxu0 %v112_v32 }
  0x31   :  { %272 = vmatpush2.msra.mxu1 %v113_v27  ;;  %201 = vmatpush2.msra.mxu0 %v111_v34 }
  0x32   :  { %273 = vmatprep.subr.mxu1 %v110_v29  ;;  %202 = vmatprep.subr.mxu0 %v108_v36 }
  0x33   :  { %274 = vmatpush2.msra.mxu1 %v109_v31  ;;  %203 = vmatpush2.msra.mxu0 %v107_v38 }
  0x34   :  { %275 = vmatprep.subr.mxu1 %v106_v33  ;;  %204 = vmatprep.subr.mxu0 %v104_v40 }
  0x35   :  { %276 = vmatpush2.msra.mxu1 %v105_v35  ;;  %205 = vmatpush2.msra.mxu0 %v103_v43 }
  0x36   :  { %277 = vmatprep.subr.mxu1 %v102_v37  ;;  %206 = vmatprep.subr.mxu0 %v100_v45 }
  0x37   :  { %278 = vmatpush2.msra.mxu1 %v101_v39  ;;  %207 = vmatpush2.msra.mxu0 %v99_v47 }
  0x38   :  { %279 = vmatprep.subr.mxu1 %v98_v42  ;;  %289 = vmatprep.mubr.f32.mxu1 %v151_v48 }
  0x39   :  { %280 = vmatpush2.msra.mxu1 %v97_v44  ;;  %208 = vmatprep.subr.mxu0 %v96_v51 }
  0x3a   :  { %281 = vmatprep.subr.mxu1 %v94_v46  ;;  %209 = vmatpush2.msra.mxu0 %v95_v53 }
  0x3b   :  { %282 = vmatpush2.msra.mxu1 %v93_v49  ;;  %210 = vmatprep.subr.mxu0 %v92_v55 }
  0x3c   :  { %283 = vmatprep.subr.mxu1 %v90_v50  ;;  %211 = vmatpush2.msra.mxu0 %v91_v57 }
  0x3d   :  { %284 = vmatpush2.msra.mxu1 %v89_v52  ;;  %212 = vmatprep.subr.mxu0 %v88_v59 }
  0x3e   :  { %285 = vmatprep.subr.mxu1 %v86_v54  ;;  %213 = vmatpush2.msra.mxu0 %v87_v61 }
  0x3f   :  { %286 = vmatpush2.msra.mxu1 %v85_v56  ;;  %214 = vmatprep.subr.mxu0 %v84_v62 }
  0x40   :  { %287 = vmatprep.subr.mxu1 %v82_v58  ;;  %215 = vmatpush2.msra.mxu0 %v83_v63 }
  0x41   :  { %288 = vmatpush2.msra.mxu1 %v81_v60  ;;  %218 = vmatprep.mubr.f32.mxu0 %v151_v48 }
  0x42   :  { %290 = vmatmul.mubr.f32.vlgmr.msra.gmra.mxu1 %v330_v41  ;;  %216 = vmatprep.subr.mxu0 %v80_v0 }
  0x43   :  { %217 = vmatpush2.msra.mxu0 %v79_v1 }
  0x44   :  { %219 = vmatmul.mubr.f32.vlgmr.msra.gmra.mxu0 %v330_v41 }
 0x102   :  { %v291_v3 = vpop.f32.mrf.mxu1 }
 0x103   :  { %332 = vtanh.f32 %v291_v3 }
 0x104   :  { %v293_v5 = vpop.f32.mrf.mxu1  ;;  %v220_v9 = vpop.f32.mrf.mxu0 }
 0x105   :  { %334 = vtanh.f32 %v293_v5  ;;  %v308_v13 = vadd.f32 %v301_v10, %v220_v9 }
 0x106   :  { %v222_v12 = vpop.f32.mrf.mxu0 }
 0x107   :  { %v309_v15 = vadd.f32 %v305_v11, %v222_v12 }
 0x110   :  { %v333_v14 = vpop.eup %332 }
 0x111   :  { %v312_v17 = vadd.f32 %v333_v14, %v308_v13 }
 0x112   :  { %v335_v16 = vpop.eup %334 }
 0x113   :  { %v313_v18 = vadd.f32 %v335_v16, %v309_v15 }
 0x115   :  { %v316_v19 = vcombine.low %v312_v17, %v313_v18 }
 0x117   :  { %331 = vst.sshfl [vmem:[%s752_s3] sm:$0x33 pattern:$0x76325410] %v316_v19 }

</bundles_post_ra>
